<compile_context>
chip_gen: v6e
topology: v6e:2x2x1
jax: 0.10.0
libtpu: 0.0.40
codegen_flags: <defaults>
</compile_context>

<pallas_src>
import functools

import numpy as np
import jax
import jax.numpy as jnp
from jax import lax
from jax.experimental import pallas as pl
from jax.experimental.pallas import tpu as pltpu

_BN_EPS = 1e-5


def _round_up(v, m):
    return ((v + m - 1) // m) * m


def _vmem_budget_bytes():
    """~75% of physical per-core VMEM: 48 MiB on v7x, 96 MiB on v5e/v6e."""
    cap = 128 * 1024 * 1024
    try:
        info = pltpu.get_tpu_info()
        cap = int(getattr(info, "vmem_capacity_bytes", cap) or cap)
    except Exception:
        pass
    return (cap * 3) // 4


# ---------------------------------------------------------------------------
# Pass 1: BatchNorm batch statistics (fused sum / sum-of-squares reduction)
# over a flattened (rows, D) view of x.  Zero batch-padding rows contribute
# nothing; rows past the true count (grid boundary block) are masked here.
# ---------------------------------------------------------------------------
def _bn_stats_kernel(x_ref, sum_ref, sumsq_ref, *, total_rows):
    @pl.when(pl.program_id(0) == 0)
    def _init():
        sum_ref[...] = jnp.zeros_like(sum_ref)
        sumsq_ref[...] = jnp.zeros_like(sumsq_ref)

    rb = x_ref.shape[0]
    x = x_ref[...].astype(jnp.float32)
    row0 = pl.program_id(0) * rb
    row_ids = row0 + lax.broadcasted_iota(jnp.int32, (rb, 1), 0)
    x = jnp.where(row_ids < total_rows, x, 0.0)
    sum_ref[...] += jnp.sum(x, axis=0, keepdims=True)
    sumsq_ref[...] += jnp.sum(x * x, axis=0, keepdims=True)


# ---------------------------------------------------------------------------
# Pass 2: BN-folded projection + tanh recurrence over (shard, time-chunk) grid.
#   meta_ref  : (2,) int32 SMEM  [min(length), max(length)]   (scalar prefetch)
#   len_ref   : (Bps, 1) int32   per-row lengths for this shard
#   x_ref     : (Bps, tt, D)     batch-major input chunk (f32)
#   w_ih_hbm  : (D, Hp)  ANY     BN-folded input weights (HBM)
#   w_hh_hbm  : (Hp, Hp) ANY     recurrent weights (HBM)
#   b_ref     : (1, Hp)  f32     BN-folded bias
#   out_ref   : (Bps, tt, Hp)    output chunk (doubles as proj buffer)
#   h_ref     : (Bps, Hp) f32    hidden-state carry, persists across the grid
#   w_*_vmem  : single-buffered weight scratch
# ---------------------------------------------------------------------------
def _make_rnn_kernel(step_dtype, unroll):
    def kernel(meta_ref, len_ref, x_ref, w_ih_hbm, w_hh_hbm, b_ref,
               out_ref, h_ref, w_ih_vmem, w_hh_vmem, load_sem):
        bs, tt, d = x_ref.shape
        hp = out_ref.shape[-1]
        i = pl.program_id(1)
        t0 = i * tt
        min_len = meta_ref[0]
        max_len = meta_ref[1]

        # One-time per shard/core: zero the h carry and DMA the constant
        # weights into single-buffered VMEM scratch (no pipeline double-buffer).
        @pl.when(i == 0)
        def _init():
            h_ref[...] = jnp.zeros_like(h_ref)
            cp_ih = pltpu.make_async_copy(w_ih_hbm, w_ih_vmem, load_sem.at[0])
            cp_hh = pltpu.make_async_copy(w_hh_hbm, w_hh_vmem, load_sem.at[1])
            cp_ih.start()
            cp_hh.start()
            cp_ih.wait()
            cp_hh.wait()

        # Chunk entirely past max(length): zeros out, h never needed again.
        @pl.when(t0 >= max_len)
        def _skip():
            out_ref[...] = jnp.zeros(out_ref.shape, out_ref.dtype)

        @pl.when(t0 < max_len)
        def _compute():
            # Hoisted BN-folded input projection for the whole chunk: one big
            # MXU matmul, written straight into out_ref (no proj scratch).
            xc = x_ref[...].astype(w_ih_vmem.dtype).reshape(bs * tt, d)
            proj = jnp.dot(xc, w_ih_vmem[...],
                           preferred_element_type=jnp.float32) + b_ref[...]
            out_ref[...] = proj.reshape(bs, tt, hp).astype(out_ref.dtype)

            w_hh = w_hh_vmem[...]          # loop-invariant loads hoisted
            lengths = len_ref[...]         # (bs, 1) int32

            def _step(t, h, *, masked):
                p_t = out_ref[:, pl.ds(t, 1), :].reshape(bs, hp)
                acc = jnp.dot(h.astype(w_hh.dtype), w_hh,
                              preferred_element_type=jnp.float32)
                h_new = jnp.tanh(
                    (p_t.astype(jnp.float32) + acc).astype(step_dtype)
                ).astype(jnp.float32)
                if masked:
                    valid = (t0 + t) < lengths                 # (bs, 1)
                    out_t = jnp.where(valid, h_new, 0.0)
                    h_next = jnp.where(valid, h_new, h)        # freeze h
                else:
                    out_t = h_new
                    h_next = h_new
                out_ref[:, pl.ds(t, 1), :] = (
                    out_t.reshape(bs, 1, hp).astype(out_ref.dtype))
                return h_next

            # Fast path: whole chunk valid for every row -> no masking work.
            @pl.when(t0 + tt <= min_len)
            def _fast():
                h_ref[...] = lax.fori_loop(
                    0, tt, functools.partial(_step, masked=False),
                    h_ref[...], unroll=unroll)

            @pl.when(t0 + tt > min_len)
            def _masked():
                h_ref[...] = lax.fori_loop(
                    0, tt, functools.partial(_step, masked=True),
                    h_ref[...], unroll=unroll)

    return kernel


# ---------------------------------------------------------------------------
# Wrapper
# ---------------------------------------------------------------------------
def rnn_block_forward(x, lengths, params, *,
                      time_block=None,
                      matmul_dtype=jnp.bfloat16,
                      out_dtype=jnp.float32,
                      step_dtype=jnp.float32,     # bf16 helps on v6e/v7x only
                      num_batch_shards=1,         # set 2 on v7x (megacore)
                      unroll=8,
                      max_out_len=None):
    """x: (B, T, D) float32 batch-first padded; lengths: (B,) ints."""
    B, T, D = x.shape
    H = params["w_hh"].shape[0]
    Hp = _round_up(H, 128)                       # lane-dense hidden width

    # --- batch sharding (leading 'parallel' grid axis; v7x megacore) ---------
    nc = int(num_batch_shards)
    if nc < 1 or B % nc != 0:
        nc = 1
    Bs = B // nc
    Bps = _round_up(max(Bs, 8), 8)               # >=8 sublane rows per shard

    lens_dev = jnp.asarray(lengths, jnp.int32).reshape(B)
    meta = jnp.stack([jnp.min(lens_dev), jnp.max(lens_dev)]).astype(jnp.int32)

    x4 = x.astype(jnp.float32).reshape(nc, Bs, T, D)   # free (splits leading dim)
    lens4 = lens_dev.reshape(nc, Bs, 1)
    if Bps != Bs:                                # only when B is tiny
        x4 = jnp.pad(x4, ((0, 0), (0, Bps - Bs), (0, 0), (0, 0)))
        lens4 = jnp.pad(lens4, ((0, 0), (0, Bps - Bs), (0, 0)))

    # --- VMEM budget -> time-chunk selection ----------------------------------
    budget = _vmem_budget_bytes()
    mdt_b = np.dtype(matmul_dtype).itemsize
    out_b = np.dtype(out_dtype).itemsize
    fixed = ((D * Hp + Hp * Hp) * mdt_b          # single-buffered weight scratch
             + Bps * Hp * 4                      # hidden-state carry
             + 4 * Hp * 4 + 2 * Bps * 4)         # bias / lengths blocks
    per_tt = 2 * Bps * (D * 4 + Hp * out_b)      # double-buffered x / out blocks
    tt_fit = max(8, ((budget - fixed) // max(per_tt, 1)) // 8 * 8)
    tt_cap = 256 if time_block is None else max(8, (int(time_block) // 8) * 8)
    tt = max(8, min(tt_fit, tt_cap, _round_up(T, 8)))
    T_pad = _round_up(T, tt)
    nt = T_pad // tt
    vmem_lim = int(min(max(budget, 32 * 1024 * 1024), 128 * 1024 * 1024))
    unroll_eff = max(1, min(int(unroll), tt))

    # --- pass 1: fused BN sum / sum-of-squares reduction ----------------------
    R = nc * Bps * T
    x_flat = x4.reshape(R, D)                    # free reshape (leading dims)
    rb = R if R <= 2048 else 2048                # mem-bound pass: own block size
    nr = -(-R // rb)
    s, sq = pl.pallas_call(
        functools.partial(_bn_stats_kernel, total_rows=R),
        grid=(nr,),
        in_specs=[pl.BlockSpec((rb, D), lambda i: (i, 0))],
        out_specs=[pl.BlockSpec((1, D), lambda i: (0, 0)),
                   pl.BlockSpec((1, D), lambda i: (0, 0))],
        out_shape=(jax.ShapeDtypeStruct((1, D), jnp.float32),
                   jax.ShapeDtypeStruct((1, D), jnp.float32)),
        compiler_params=pltpu.CompilerParams(
            dimension_semantics=("arbitrary",), vmem_limit_bytes=vmem_lim),
        cost_estimate=pl.CostEstimate(flops=3 * R * D, transcendentals=0,
                                      bytes_accessed=R * D * 4 + 8 * D),
    )(x_flat)

    n = float(B * T)                             # true count (padding included,
                                                 # as BN runs before packing)
    mean = s[0] / n
    # TODO(synk): E[x^2]-mean^2 in f32 can cancel for large-mean features; use a
    # shifted / two-pass reduction if tighter tolerances are required.
    var = jnp.maximum(sq[0] / n - mean * mean, 0.0)

    # --- fold BatchNorm into the projection (param-sized math) ----------------
    gamma = params["gamma"].astype(jnp.float32)
    beta = params["beta"].astype(jnp.float32)
    scale = gamma * lax.rsqrt(var + _BN_EPS)                     # (D,)
    shift = beta - mean * scale                                  # (D,)

    w_ih_t = params["w_ih"].astype(jnp.float32).T                # (D, H)
    w_hh_t = params["w_hh"].astype(jnp.float32).T                # (H, H)
    bias = shift @ w_ih_t + params["b_ih"] + params["b_hh"]      # (H,)

    w_ih_eff = jnp.pad(scale[:, None] * w_ih_t,
                       ((0, 0), (0, Hp - H))).astype(matmul_dtype)
    w_hh_eff = jnp.pad(w_hh_t, ((0, Hp - H), (0, Hp - H))).astype(matmul_dtype)
    bias_eff = jnp.pad(bias, (0, Hp - H)).reshape(1, Hp).astype(jnp.float32)

    # --- pass 2: hoisted projection + serial tanh recurrence ------------------
    ce = pl.CostEstimate(
        flops=int(2 * nc * Bps * T_pad * Hp * (D + Hp)),
        transcendentals=int(nc * Bps * T_pad * Hp),
        bytes_accessed=int(nc * Bps * T * D * 4 + nc * Bps * T_pad * Hp * out_b
                           + (D * Hp + Hp * Hp) * mdt_b))

    grid_spec = pltpu.PrefetchScalarGridSpec(
        num_scalar_prefetch=1,                    # meta = [min(len), max(len)]
        grid=(nc, nt),
        in_specs=[
            pl.BlockSpec((None, Bps, 1), lambda c, i, m: (c, 0, 0)),        # len
            pl.BlockSpec((None, Bps, tt, D), lambda c, i, m: (c, 0, i, 0)),  # x
            pl.BlockSpec(memory_space=pl.ANY),    # W_ih (BN-folded), stays in HBM
            pl.BlockSpec(memory_space=pl.ANY),    # W_hh, stays in HBM
            pl.BlockSpec((1, Hp), lambda c, i, m: (0, 0)),                  # bias
        ],
        out_specs=pl.BlockSpec((None, Bps, tt, Hp),
                               lambda c, i, m: (c, 0, i, 0)),
        scratch_shapes=[
            pltpu.VMEM((Bps, Hp), jnp.float32),       # hidden-state carry
            pltpu.VMEM((D, Hp), matmul_dtype),        # W_ih, single-buffered
            pltpu.VMEM((Hp, Hp), matmul_dtype),       # W_hh, single-buffered
            pltpu.SemaphoreType.DMA((2,)),            # weight-load semaphores
        ],
    )

    out4 = pl.pallas_call(
        _make_rnn_kernel(step_dtype=step_dtype, unroll=unroll_eff),
        grid_spec=grid_spec,
        out_shape=jax.ShapeDtypeStruct((nc, Bps, T_pad, Hp), out_dtype),
        compiler_params=pltpu.CompilerParams(
            dimension_semantics=("parallel", "arbitrary"),
            vmem_limit_bytes=vmem_lim),
        cost_estimate=ce,
    )(meta, lens4, x4, w_ih_eff, w_hh_eff, bias_eff)

    # Batch-major output: no (T,B)->(B,T) transpose round trip in HBM.
    out = out4[:, :Bs].reshape(B, T_pad, Hp)
    if max_out_len is not None:
        t_out = int(max_out_len)
    else:
        # TODO(synk): forces a host sync; pass max_out_len to stay jit-traceable.
        t_out = int(jax.device_get(jnp.max(lens_dev)))
    return out[:, :t_out, :H]                    # trim time + Hp padding


# ---------------------------------------------------------------------------
# Pure-JAX reference (for correctness checking) and parameter init
# ---------------------------------------------------------------------------
def rnn_block_reference(x, lengths, params):
    B, T, D = x.shape
    xf = x.reshape(B * T, D).astype(jnp.float32)
    mean = jnp.mean(xf, axis=0)
    var = jnp.mean(xf * xf, axis=0) - mean * mean
    xn = ((x - mean) * (params["gamma"] * lax.rsqrt(var + _BN_EPS))
          + params["beta"])
    w_ih_t = params["w_ih"].T
    w_hh_t = params["w_hh"].T
    b = params["b_ih"] + params["b_hh"]
    lens = jnp.asarray(lengths, jnp.int32)
    H = params["w_hh"].shape[0]
    h = jnp.zeros((B, H), jnp.float32)
    outs = []
    for t in range(T):
        h_new = jnp.tanh(xn[:, t, :] @ w_ih_t + h @ w_hh_t + b)
        valid = (t < lens)[:, None]
        outs.append(jnp.where(valid, h_new, 0.0))
        h = jnp.where(valid, h_new, h)
    out = jnp.stack(outs, axis=1)
    return out[:, :int(np.max(np.asarray(lengths)))]


def init_params(key, input_size, hidden_size):
    """PyTorch-shaped params. nn.RNN: U(-1/sqrt(H), 1/sqrt(H)); BN: gamma=1, beta=0."""
    k = 1.0 / np.sqrt(hidden_size)
    k1, k2, k3, k4 = jax.random.split(key, 4)
    return {
        "w_ih": jax.random.uniform(k1, (hidden_size, input_size), jnp.float32, -k, k),
        "w_hh": jax.random.uniform(k2, (hidden_size, hidden_size), jnp.float32, -k, k),
        "b_ih": jax.random.uniform(k3, (hidden_size,), jnp.float32, -k, k),
        "b_hh": jax.random.uniform(k4, (hidden_size,), jnp.float32, -k, k),
        "gamma": jnp.ones((input_size,), jnp.float32),
        "beta": jnp.zeros((input_size,), jnp.float32),
    }
    # TODO(synk): nn.RNN dropout is a no-op for a single layer, so it is omitted.


if __name__ == "__main__":
    key = jax.random.PRNGKey(0)
    kx1, kx2, kp = jax.random.split(key, 3)

    B, D, H = 2, 16, 32
    params = init_params(kp, D, H)

    # --- case 1: default config (bf16 MXU operands), single time chunk -------
    T1 = 8
    lengths1 = np.array([8, 5], dtype=np.int32)    # sorted desc (enforce_sorted)
    x1 = jax.random.normal(kx1, (B, T1, D), dtype=jnp.float32)
    m1 = (np.arange(T1)[None, :, None] < lengths1[:, None, None]).astype(np.float32)
    x1 = x1 * jnp.asarray(m1)                       # zero the padded positions

    out1 = jax.block_until_ready(rnn_block_forward(x1, lengths1, params))
    assert out1.shape == (B, int(lengths1.max()), H)
    assert bool(jnp.all(jnp.isfinite(out1)))
    # padded region of the shorter sequence must be exactly zero
    assert float(jnp.abs(out1[1, int(lengths1[1]):, :]).max()) == 0.0

    # --- case 2: multi-chunk (fast / masked / skip paths), f32 MXU, vs ref ----
    T2 = 24
    lengths2 = np.array([16, 12], dtype=np.int32)
    x2 = jax.random.normal(kx2, (B, T2, D), dtype=jnp.float32)
    m2 = (np.arange(T2)[None, :, None] < lengths2[:, None, None]).astype(np.float32)
    x2 = x2 * jnp.asarray(m2)

    ref2 = rnn_block_reference(x2, lengths2, params)
    for shards in (1, 2):       # shards=2 exercises the v7x megacore shard path
        out2 = jax.block_until_ready(
            rnn_block_forward(x2, lengths2, params, time_block=8,
                              matmul_dtype=jnp.float32,
                              num_batch_shards=shards))
        assert out2.shape == ref2.shape
        assert float(jnp.max(jnp.abs(out2 - ref2))) < 2e-3

    print("KERNEL_OK")
</pallas_src>

<mosaic_0001>
module attributes {stable_mosaic.version = 11 : i64} {
  func.func @_bn_stats_kernel(%arg0: i32, %arg1: memref<64x16xf32, #tpu.memory_space<vmem>>, %arg2: memref<1x16xf32, #tpu.memory_space<vmem>>, %arg3: memref<1x16xf32, #tpu.memory_space<vmem>>) attributes {dimension_semantics = [#tpu.dimension_semantics<arbitrary>], iteration_bounds = array<i64: 1>, scalar_prefetch = 0 : i64, scratch_operands = 0 : i64, tpu.core_type = #tpu.core_type<tc>, window_params = [{transform_indices = @transform_0, window_bounds = array<i64: 64, 16>}, {pipeline_mode = #tpu.pipeline_mode<synchronous>, transform_indices = @transform_1, window_bounds = array<i64: 1, 16>}, {pipeline_mode = #tpu.pipeline_mode<synchronous>, transform_indices = @transform_2, window_bounds = array<i64: 1, 16>}]} {
    %c0_i32 = arith.constant 0 : i32
    %0 = arith.cmpi eq, %arg0, %c0_i32 : i32
    %1 = arith.extui %0 : i1 to i32
    %c0_i32_0 = arith.constant 0 : i32
    %2 = arith.cmpi ne, %1, %c0_i32_0 : i32
    scf.if %2 {
      %cst_13 = arith.constant 0.000000e+00 : f32
      %25 = vector.broadcast %cst_13 : f32 to vector<1x16xf32>
      %c0_14 = arith.constant 0 : index
      %c0_15 = arith.constant 0 : index
      %26 = vector.load %arg2[%c0_14, %c0_15] : memref<1x16xf32, #tpu.memory_space<vmem>>, vector<1x16xf32>
      tpu.vector_store %arg2[%c0_14, %c0_15], %25 {strides = array<i32>} : memref<1x16xf32, #tpu.memory_space<vmem>>, vector<1x16xf32>,
      %cst_16 = arith.constant 0.000000e+00 : f32
      %27 = vector.broadcast %cst_16 : f32 to vector<1x16xf32>
      %c0_17 = arith.constant 0 : index
      %c0_18 = arith.constant 0 : index
      %28 = vector.load %arg3[%c0_17, %c0_18] : memref<1x16xf32, #tpu.memory_space<vmem>>, vector<1x16xf32>
      tpu.vector_store %arg3[%c0_17, %c0_18], %27 {strides = array<i32>} : memref<1x16xf32, #tpu.memory_space<vmem>>, vector<1x16xf32>,
    } else {
    }
    %c0 = arith.constant 0 : index
    %c0_1 = arith.constant 0 : index
    %3 = vector.load %arg1[%c0, %c0_1] : memref<64x16xf32, #tpu.memory_space<vmem>>, vector<64x16xf32>
    %c64_i32 = arith.constant 64 : i32
    %4 = arith.muli %arg0, %c64_i32 : i32
    %5 = tpu.iota {dimensions = array<i32: 0>} : vector<64x1xi32>
    %6 = vector.broadcast %4 : i32 to vector<64x1xi32>
    %7 = arith.addi %6, %5 : vector<64x1xi32>
    %c64_i32_2 = arith.constant 64 : i32
    %8 = vector.broadcast %c64_i32_2 : i32 to vector<64x1xi32>
    %9 = arith.cmpi slt, %7, %8 : vector<64x1xi32>
    %cst = arith.constant 0.000000e+00 : f32
    %10 = vector.shape_cast %9 : vector<64x1xi1> to vector<64x1xi1>
    %11 = vector.broadcast %10 : vector<64x1xi1> to vector<64x16xi1>
    %12 = vector.broadcast %cst : f32 to vector<64x16xf32>
    %13 = arith.select %11, %3, %12 : vector<64x16xi1>, vector<64x16xf32>
    %c0_3 = arith.constant 0 : index
    %c0_4 = arith.constant 0 : index
    %14 = vector.load %arg2[%c0_3, %c0_4] : memref<1x16xf32, #tpu.memory_space<vmem>>, vector<1x16xf32>
    %cst_5 = arith.constant dense<0.000000e+00> : vector<16xf32>
    %15 = vector.multi_reduction <add>, %13, %cst_5 [0] : vector<64x16xf32> to vector<16xf32>
    %16 = vector.shape_cast %15 : vector<16xf32> to vector<1x16xf32>
    %17 = arith.addf %14, %16 : vector<1x16xf32>
    %c0_6 = arith.constant 0 : index
    %c0_7 = arith.constant 0 : index
    %18 = vector.load %arg2[%c0_6, %c0_7] : memref<1x16xf32, #tpu.memory_space<vmem>>, vector<1x16xf32>
    tpu.vector_store %arg2[%c0_6, %c0_7], %17 {strides = array<i32>} : memref<1x16xf32, #tpu.memory_space<vmem>>, vector<1x16xf32>,
    %c0_8 = arith.constant 0 : index
    %c0_9 = arith.constant 0 : index
    %19 = vector.load %arg3[%c0_8, %c0_9] : memref<1x16xf32, #tpu.memory_space<vmem>>, vector<1x16xf32>
    %20 = arith.mulf %13, %13 : vector<64x16xf32>
    %cst_10 = arith.constant dense<0.000000e+00> : vector<16xf32>
    %21 = vector.multi_reduction <add>, %20, %cst_10 [0] : vector<64x16xf32> to vector<16xf32>
    %22 = vector.shape_cast %21 : vector<16xf32> to vector<1x16xf32>
    %23 = arith.addf %19, %22 : vector<1x16xf32>
    %c0_11 = arith.constant 0 : index
    %c0_12 = arith.constant 0 : index
    %24 = vector.load %arg3[%c0_11, %c0_12] : memref<1x16xf32, #tpu.memory_space<vmem>>, vector<1x16xf32>
    tpu.vector_store %arg3[%c0_11, %c0_12], %23 {strides = array<i32>} : memref<1x16xf32, #tpu.memory_space<vmem>>, vector<1x16xf32>,
    return
  }
  func.func @transform_0(%arg0: i32) -> (i32, i32) {
    %c0_i32 = arith.constant 0 : i32
    %c0_i32_0 = arith.constant 0 : i32
    return %arg0, %c0_i32 : i32, i32
  }
  func.func @transform_1(%arg0: i32) -> (i32, i32) {
    %c0_i32 = arith.constant 0 : i32
    %c0_i32_0 = arith.constant 0 : i32
    %c0_i32_1 = arith.constant 0 : i32
    return %c0_i32, %c0_i32_0 : i32, i32
  }
  func.func @transform_2(%arg0: i32) -> (i32, i32) {
    %c0_i32 = arith.constant 0 : i32
    %c0_i32_0 = arith.constant 0 : i32
    %c0_i32_1 = arith.constant 0 : i32
    return %c0_i32, %c0_i32_0 : i32, i32
  }
}

</mosaic_0001>

<bundles_post_ra>
// kernel: tpu_custom_call.1
= control target key start
LH: loop header
LB: loop body
LE: loop exit
PB: predicated region body
PF: predicated region fallthrough
CT: control target
= control target key end

     0   :  { %8 = vsyncpa [#allocation3], 0  ;;  %vm16_vm0 = vcmask 122880   ;;  %vm79_vm1 = vcmask 130048   ;;  %v211_v3 = vmov 0.0   ;;  %s279_s0 = inlined_call_operand.vmem [shape: f32[64,16], index: 0, kind: input, shape index: {}]   ;;  %s280_s1 = inlined_call_operand.hbm [shape: f32[1,16], index: 1, kind: output, shape index: {0}]   ;;  %s281_s2 = inlined_call_operand.hbm [shape: f32[1,16], index: 2, kind: output, shape index: {1}]  }
   0x1   :  { %v19_v0 = vld [vmem:[%s279_s0] sm:$0xff]  ;;  %v20_v1 = vld [vmem:[%s279_s0 + $0x8] sm:$0xff]  ;;  %v21_v2 = vld [vmem:[%s279_s0 + $0x10] sm:$0xff]  ;;  %17 = vst.msk [vmem:[#allocation2] sm:$0x1] %vm16_vm0, %v211_v3 }
   0x2   :  { %18 = vst.msk [vmem:[#allocation4] sm:$0x1] %vm16_vm0, %v211_v3  ;;  %v22_v4 = vld [vmem:[%s279_s0 + $0x18] sm:$0xff]  ;;  %v80_v5 = vsel %vm79_vm1, %v19_v0, 0.0  ;;  %v81_v6 = vsel %vm79_vm1, %v20_v1, 0.0  ;;  %v83_v7 = vsel %vm79_vm1, %v21_v2, 0.0  ;;  %v105_v8 = vmul.f32 %v19_v0, %v19_v0 }
   0x3   :  { %v23_v9 = vld [vmem:[%s279_s0 + $0x20] sm:$0xff]  ;;  %v82_v10 = vadd.f32 %v81_v6, %v80_v5  ;;  %v85_v11 = vsel %vm79_vm1, %v22_v4, 0.0  ;;  %v106_v12 = vmul.f32 %v20_v1, %v20_v1  ;;  %v107_v13 = vmul.f32 %v21_v2, %v21_v2 }
   0x4   :  { %9 = vsyncpa [#allocation5], 0  ;;  %v24_v14 = vld [vmem:[%s279_s0 + $0x28] sm:$0xff]  ;;  %v108_v16 = vmul.f32 %v22_v4, %v22_v4  ;;  %v87_v17 = vsel %vm79_vm1, %v23_v9, 0.0  ;;  %v109_v18 = vmul.f32 %v23_v9, %v23_v9  ;;  %v113_v19 = vsel %vm79_vm1, %v105_v8, 0.0  ;;  %v25_v21 = vld [vmem:[%s279_s0 + $0x30] sm:$0xff] }
   0x5   :  { %v84_v15 = vadd.f32 %v83_v7, %v82_v10  ;;  %v114_v20 = vsel %vm79_vm1, %v106_v12, 0.0  ;;  %v116_v24 = vsel %vm79_vm1, %v107_v13, 0.0  ;;  %v89_v25 = vsel %vm79_vm1, %v24_v14, 0.0  ;;  %v26_v28 = vld [vmem:[%s279_s0 + $0x38] sm:$0xff]  ;;  %s212_s0 = smov [#allocation2]   ;;  %s213_s26 = smov [#allocation4]  }
   0x6   :  { %v115_v23 = vadd.f32 %v114_v20, %v113_v19  ;;  %v110_v26 = vmul.f32 %v24_v14, %v24_v14  ;;  %v118_v27 = vsel %vm79_vm1, %v108_v16, 0.0  ;;  %v91_v31 = vsel %vm79_vm1, %v25_v21, 0.0  ;;  %s142_s25 = sshll.u32 %s212_s0, 4  ;;  %s152_s27 = sshll.u32 %s213_s26, 4  ;;  %s143_s25 = int_to_ptr.vmem [resolvable:$true] %s142_s25  ;;  %s153_s27 = int_to_ptr.vmem [resolvable:$true] %s152_s27 }
   0x7   :  { %v86_v22 = vadd.f32 %v85_v11, %v84_v15  ;;  %v111_v32 = vmul.f32 %v25_v21, %v25_v21  ;;  %v120_v33 = vsel %vm79_vm1, %v109_v18, 0.0  ;;  %v93_v36 = vsel %vm79_vm1, %v26_v28, 0.0  ;;  %s167_s28 = scalar_lea.vmem %s143_s25, 16  ;;  %s171_s29 = scalar_lea.vmem %s143_s25, 32 }
   0x8   :  { %v117_v30 = vadd.f32 %v116_v24, %v115_v23  ;;  %v112_v37 = vmul.f32 %v26_v28, %v26_v28  ;;  %v122_v38 = vsel %vm79_vm1, %v110_v26, 0.0  ;;  %v78_v55 = vld [vmem:[#allocation2] sm:$0x1]  ;;  %p168_p0 = scmp.ne.s32.totalorder %s143_s25, %s167_s28  ;;  %p172_p1 = scmp.lt.s32.totalorder %s143_s25, %s143_s25 }
   0x9   :  { %v88_v29 = vadd.f32 %v87_v17, %v86_v22  ;;  %v124_v41 = vsel %vm79_vm1, %v111_v32, 0.0  ;;  %v104_v60 = vld [vmem:[#allocation4] sm:$0x1]  ;;  %p173_p2 = scmp.lt.s32.totalorder %s171_s29, %s167_s28 }
   0xa   :  { %v119_v35 = vadd.f32 %v118_v27, %v117_v30  ;;  %v126_v44 = vsel %vm79_vm1, %v112_v37, 0.0 }
   0xb   :  { %v90_v34 = vadd.f32 %v89_v25, %v88_v29  ;;  %p174_p3 = por %p173_p2, %p172_p1 }
   0xc   :  { %v121_v40 = vadd.f32 %v120_v33, %v119_v35 }
   0xd   :  { %v92_v39 = vadd.f32 %v91_v31, %v90_v34  ;;  %p175_p4 = pnand %p174_p3, %p168_p0 }
   0xe   :  { %v123_v43 = vadd.f32 %v122_v38, %v121_v40 }
   0xf   :  { %v94_v42 = vadd.f32 %v93_v36, %v92_v39 }
  0x10   :  { %v125_v46 = vadd.f32 %v124_v41, %v123_v43 }
  0x11   :  { %v95_v45 = vrot.slane %v94_v42, 4 }
  0x12   :  { %v127_v48 = vadd.f32 %v126_v44, %v125_v46 }
  0x13   :  { %v96_v47 = vadd.f32 %v95_v45, %v94_v42 }
  0x14   :  { %v128_v50 = vrot.slane %v127_v48, 4 }
  0x15   :  { %v97_v49 = vrot.slane %v96_v47, 2 }
  0x16   :  { %v129_v52 = vadd.f32 %v128_v50, %v127_v48 }
  0x17   :  { %v98_v51 = vadd.f32 %v97_v49, %v96_v47 }
  0x18   :  { %v130_v54 = vrot.slane %v129_v52, 2 }
  0x19   :  { %v99_v53 = vrot.slane %v98_v51, 1 }
  0x1a   :  { %v131_v57 = vadd.f32 %v130_v54, %v129_v52 }
  0x1b   :  { %v100_v56 = vadd.f32 %v99_v53, %v98_v51 }
  0x1c   :  { %v132_v59 = vrot.slane %v131_v57, 1 }
  0x1d   :  { %v101_v58 = vadd.f32 %v100_v56, %v78_v55 }
  0x1e   :  { %v133_v61 = vadd.f32 %v132_v59, %v131_v57 }
  0x1f   :  { %103 = vst.msk [vmem:[#allocation2] sm:$0x1] %vm16_vm0, %v101_v58 }
  0x20   :  { %178 = shalt.err (!%p175_p4)
}
  0x21   :  { %145 = dma.vmem_to_hbm [thread:$0]  %s143_s25, 16, %s280_s1, [#allocation3]   ;;  %v134_v62 = vadd.f32 %v133_v61, %v104_v60 }
  0x22   :  { %s187_s4 = scalar_lea.vmem %s153_s27, 16  ;;  %s191_s5 = scalar_lea.vmem %s153_s27, 32 }
  0x23   :  { %135 = vst.msk [vmem:[#allocation4] sm:$0x1] %vm16_vm0, %v134_v62  ;;  %p188_p5 = scmp.ne.s32.totalorder %s153_s27, %s187_s4  ;;  %p192_p6 = scmp.lt.s32.totalorder %s153_s27, %s153_s27 }
  0x24   :  { %p193_p7 = scmp.lt.s32.totalorder %s191_s5, %s187_s4 }
  0x26   :  { %p194_p8 = por %p193_p7, %p192_p6 }
  0x28   :  { %p195_p9 = pnand %p194_p8, %p188_p5 }
  0x2a   :  { %198 = shalt.err (!%p195_p9)
}
  0x2b   :  { %155 = dma.vmem_to_hbm [thread:$0]  %s153_s27, 16, %s281_s2, [#allocation5]  }
  0x2c   :  { %207 = dma.done.wait [#allocation3], 16  }
  0x2d   :  { %208 = vsyncadd [#allocation3], 4294967280 }
  0x2e   :  { %209 = dma.done.wait [#allocation5], 16  }
  0x2f   :  { %210 = vsyncadd [#allocation5], 4294967280 }
  0x30   :  { %162 = vsyncpa [#allocation3], 1 }
  0x31   :  { %163 = vsyncpa [#allocation5], 1 }

</bundles_post_ra>
